<compile_context>
chip_gen: v7x
topology: tpu7x:2x2x1
jax: 0.10.0
libtpu: 0.0.40
codegen_flags: <defaults>
</compile_context>

<pallas_src>
import jax
import jax.numpy as jnp
from jax.experimental import pallas as pl
from jax.experimental.pallas import tpu as pltpu


def _patch_unembed_kernel(x_ref, o_ref):
    # x_ref: (tB, tL, C) VMEM tile; o_ref: (tB, C, tL) VMEM tile.
    o_ref[...] = jnp.swapaxes(x_ref[...], 1, 2)


def _choose_tiling(B, L, C, itemsize, max_block_bytes, min_steps, min_dma_bytes):
    """Pick (tB, tL): block = (tB, tL, C) in, (tB, C, tL) out."""
    slab = L * C * itemsize          # bytes of one batch element
    row = C * itemsize               # bytes of one L position

    if B > 1 and slab < min_dma_bytes:
        # Tiny per-frame slabs: fold batches so each DMA stays big, while
        # keeping ~min_steps grid steps for pipeline depth.
        tB = B // min_steps if B >= min_steps else 1
        tB = max(1, min(tB, max(1, max_block_bytes // max(slab, 1)), B))
        for t in range(tB, 0, -1):          # prefer a divisor of B: no masked
            if B % t == 0:                  # boundary block on the batch axis
                tB = t
                break
        return tB, L

    # Tile L (tB == 1).
    if L <= 128:
        return 1, L                          # full-dim block; (8,128) rule met
    grid_l_min = max(1, -(-min_steps // B))  # ceil(min_steps / B)
    if B == 1:
        grid_l_min = max(grid_l_min, 2)      # keep both v7x TCs busy
    if grid_l_min == 1 and slab <= max_block_bytes:
        return 1, L                          # whole frame; B already >= min_steps
    tl_cap = max(128, (max_block_bytes // row // 128) * 128)
    tl_steps = max(128, (L // grid_l_min // 128) * 128)
    tL = min(tl_cap, tl_steps)
    if tL >= L:
        return 1, L
    # Prefer the largest 128-multiple divisor of L: every output store is a
    # full-width unmasked vst and there is no masked boundary block.
    for t in range(tL, 127, -128):
        if L % t == 0:
            return 1, t
    return 1, tL                             # ragged last block, masked writeback


def patch_unembed(x, x_size, embed_dim, *,
                  max_block_bytes=4 * 1024 * 1024,
                  min_pallas_bytes=4 * 1024 * 1024,
                  min_steps=8,
                  min_dma_bytes=1 * 1024 * 1024):
    """x: (B, L, C=embed_dim); x_size=(H, W), H*W == L. Returns (B, C, H, W)."""
    B, L, C = x.shape
    H, W = x_size
    assert C == embed_dim and H * W == L

    itemsize = jnp.dtype(x.dtype).itemsize
    total_bytes = B * L * C * itemsize

    # Tiny inputs: Pallas launch + pipeline ramp exceeds the transfer time;
    # XLA's native transpose is already at roofline.
    if total_bytes < min_pallas_bytes:
        return jnp.swapaxes(x, 1, 2).reshape(B, C, H, W)

    tB, tL = _choose_tiling(B, L, C, itemsize,
                            max_block_bytes, min_steps, min_dma_bytes)
    grid_b = pl.cdiv(B, tB)
    grid_l = pl.cdiv(L, tL)

    block_bytes = tB * tL * C * itemsize
    # Double-buffered input + output blocks plus compiler slack, computed from
    # the actual footprint (not a blanket 32 MiB).
    vmem_limit = min(96 * 1024 * 1024,
                     max(16 * 1024 * 1024, 4 * block_bytes + 4 * 1024 * 1024))

    out_blc = pl.pallas_call(
        _patch_unembed_kernel,
        out_shape=jax.ShapeDtypeStruct((B, C, L), x.dtype),
        grid=(grid_b, grid_l),
        in_specs=[pl.BlockSpec((tB, tL, C), lambda b, l: (b, l, 0))],
        out_specs=pl.BlockSpec((tB, C, tL), lambda b, l: (b, 0, l)),
        compiler_params=pltpu.CompilerParams(
            dimension_semantics=("parallel", "parallel"),
            vmem_limit_bytes=vmem_limit,
        ),
        cost_estimate=pl.CostEstimate(
            flops=0,
            transcendentals=0,
            bytes_accessed=2 * total_bytes,      # read + write, pure bandwidth
        ),
    )(x)

    # Free reshape (lane-minor layout unchanged): NCHW.
    return out_blc.reshape(B, C, H, W)


if __name__ == "__main__":
    key = jax.random.PRNGKey(0)

    # (B, H, W, C, dtype, kwargs) — exercise: XLA fallback, batch-folded path,
    # evenly L-tiled path, ragged masked-boundary path, bf16 pass-through.
    test_cases = [
        (2, 16, 16, 32, jnp.float32, dict()),                      # tiny -> fallback
        (16, 16, 16, 32, jnp.float32, dict(min_pallas_bytes=0)),   # batch fold (tB=2)
        (1, 64, 64, 64, jnp.float32, dict(min_pallas_bytes=0)),    # L tiled, divisible
        (1, 20, 20, 704, jnp.float32, dict(min_pallas_bytes=0)),   # ragged L boundary
        (2, 16, 16, 128, jnp.bfloat16, dict(min_pallas_bytes=0)),  # bf16 pass-through
    ]

    for i, (B, H, W, C, dtype, kwargs) in enumerate(test_cases):
        L = H * W
        key, sub = jax.random.split(key)
        x = jax.random.normal(sub, (B, L, C), dtype=dtype)

        out = patch_unembed(x, (H, W), embed_dim=C, **kwargs)
        out = jax.block_until_ready(out)

        # Reference: x.transpose(1, 2).view(B, C, H, W)
        ref = jnp.transpose(x, (0, 2, 1)).reshape(B, C, H, W)
        assert out.shape == (B, C, H, W), (i, out.shape)
        assert out.dtype == x.dtype, (i, out.dtype)
        assert jnp.array_equal(out, ref), f"mismatch vs reference in case {i}"

    print("KERNEL_OK")
</pallas_src>

<mosaic_0001>
module attributes {stable_mosaic.version = 11 : i64} {
  func.func @_patch_unembed_kernel(%arg0: i32, %arg1: i32, %arg2: memref<2x256x32xf32, #tpu.memory_space<vmem>>, %arg3: memref<2x32x256xf32, #tpu.memory_space<vmem>>) attributes {dimension_semantics = [#tpu.dimension_semantics<parallel>, #tpu.dimension_semantics<parallel>], iteration_bounds = array<i64: 8, 1>, scalar_prefetch = 0 : i64, scratch_operands = 0 : i64, tpu.core_type = #tpu.core_type<tc>, window_params = [{transform_indices = @transform_0, window_bounds = array<i64: 2, 256, 32>}, {transform_indices = @transform_1, window_bounds = array<i64: 2, 32, 256>}]} {
    %c0 = arith.constant 0 : index
    %c0_0 = arith.constant 0 : index
    %c0_1 = arith.constant 0 : index
    %0 = vector.load %arg2[%c0, %c0_0, %c0_1] : memref<2x256x32xf32, #tpu.memory_space<vmem>>, vector<2x256x32xf32>
    %1 = tpu.transpose %0, [0, 2, 1] : vector<2x256x32xf32> -> vector<2x32x256xf32>
    %c0_2 = arith.constant 0 : index
    %c0_3 = arith.constant 0 : index
    %c0_4 = arith.constant 0 : index
    %2 = vector.load %arg3[%c0_2, %c0_3, %c0_4] : memref<2x32x256xf32, #tpu.memory_space<vmem>>, vector<2x32x256xf32>
    tpu.vector_store %arg3[%c0_2, %c0_3, %c0_4], %1 {strides = array<i32>} : memref<2x32x256xf32, #tpu.memory_space<vmem>>, vector<2x32x256xf32>,
    return
  }
  func.func @transform_0(%arg0: i32, %arg1: i32) -> (i32, i32, i32) {
    %c0_i32 = arith.constant 0 : i32
    %c0_i32_0 = arith.constant 0 : i32
    return %arg0, %arg1, %c0_i32 : i32, i32, i32
  }
  func.func @transform_1(%arg0: i32, %arg1: i32) -> (i32, i32, i32) {
    %c0_i32 = arith.constant 0 : i32
    %c0_i32_0 = arith.constant 0 : i32
    return %arg0, %c0_i32, %arg1 : i32, i32, i32
  }
}

</mosaic_0001>

<bundles_post_ra>
// kernel: tpu_custom_call.1
= control target key start
LH: loop header
LB: loop body
LE: loop exit
PB: predicated region body
PF: predicated region fallthrough
CT: control target
= control target key end

     0   :  { %6 = vsyncpa [#allocation3], 0  ;;  %s827_s0 = inlined_call_operand.vmem [shape: f32[16,256,32], index: 0, kind: input, shape index: {}]   ;;  %s828_s1 = inlined_call_operand.hbm [shape: f32[16,32,256], index: 1, kind: output, shape index: {}]  }
   0x1   :  { %8 = vsyncpa [#allocation3 + $0x1], 0  ;;  %s624_s6 = smov 0   ;;  %s626_s7 = smov 0  }
   0x2   :  { %s628_s8 = smov 0   ;;  %s630_s9 = smov 0  }
   0x3   :  { %s632_s10 = smov 0   ;;  %s634_s11 = smov 0  }
   0x4 LB: > { %s456_s12 = sadd.s32 4294967295, %s609_s11   ;;  %s457_s13 = sadd.s32 4294967294, %s609_s11   ;;  %s609_s11 = sphi %s634_s11, %s14_s11   ;;  %s605_s10 = sphi %s632_s10, %s835_s10   ;;  %s601_s9 = sphi %s630_s9, %s834_s9   ;;  %s597_s8 = sphi %s628_s8, %s833_s8   ;;  %s593_s7 = sphi %s626_s7, %s832_s7   ;;  %s589_s6 = sphi %s624_s6, %s831_s6  }
   0x5   : > { %s26_s14 = sadd.s32 1, %s605_s10  ;;  %s63_s15 = sadd.s32 1, %s597_s8 }
   0x6   : > { %p28_p0 = scmp.ge.s32.totalorder %s26_s14, 8  ;;  %p73_p1 = scmp.ne.s32.totalorder %s597_s8, %s593_s7 }
   0x7   : > { %p74_p2 = scmp.eq.s32.totalorder %s456_s12, 7  ;;  %p79_p3 = scmp.ne.s32.totalorder %s593_s7, %s589_s6 }
   0x8   : > { %s837_s14 = smov (%p28_p0, %s26_s14), 0  ;;  %p80_p5 = scmp.eq.s32.totalorder %s457_s13, 7 }
   0x9   : > { %p664_p4 = por %p74_p2, %p73_p1  ;;  %s58_s17 = ssub.s32 %s605_s10, %s837_s14 }
   0xa   : > { %p460_p6 = scmp.ge.s32.totalorder %s609_s11, 1  ;;  %p61_p7 = scmp.eq.s32.totalorder %s58_s17, 0 }
   0xb   : > { %p671_p8 = por %p80_p5, %p79_p3  ;;  %p113_p9 = scmp.lt.s32.totalorder %s609_s11, 9 }
   0xc   : > { %s677_s19 = scalar_select %p61_p7, %s597_s8, %s63_s15  }
   0xd   : > { %p114_p10 = pnand %p460_p6, %p113_p9 }
   0xe   : > { %s462_s20 = sshll.u32 (!%p114_p10), %s601_s9, 1  ;;  %s135_s25 = sand.u32 (!%p114_p10), 1, %s593_s7  }
   0xf   : > { %117 = sbr.rel (%p114_p10) target bundleno = 247 (0xf7), region = 24  ;;  %p140_p11 = scmp.lt.s32.totalorder (!%p114_p10), %s462_s20, 15 }
  0x10   : > { %s461_s26 = sshll.u32 (!%p114_p10), %s135_s25, 7  ;;  %s473_s28 = sshll.u32 (!%p114_p10), %s601_s9, 11 }
  0x11   : > { %s752_s27 = scalar_lea.vmem (!%p114_p10), [#allocation2], %s461_s26  ;;  %s773_s3 = scalar_lea.hbm (!%p114_p10), %s828_s1, %s473_s28 }
  0x12   : > { %s377_s29 = sshll.u32 (!%p114_p10), %s752_s27, 4  ;;  %s781_s4 = scalar_lea.sflag (!%p114_p10), [#allocation3], %s135_s25  ;;  %s775_s29 = int_to_ptr.vmem [resolvable:$true] %s377_s29 }
  0x13   : > { %s531_s5 = scalar_lea.vmem (!%p114_p10), %s775_s29, 2048  ;;  %s611_s9 = smov (!%p114_p10), [#allocation2]  }
  0x14   : > { %p532_p12 = scmp.ne.s32.totalorder (!%p114_p10), %s775_s29, %s531_s5  ;;  %s535_s12 = sshll.u32 (!%p114_p10), %s611_s9, 4  ;;  %s536_s12 = int_to_ptr.vmem [resolvable:$false] %s535_s12 }
  0x15   : > { %s537_s13 = scalar_lea.vmem (!%p114_p10), %s536_s12, 4096  ;;  %p538_p1 = scmp.lt.s32.totalorder (!%p114_p10), %s775_s29, %s536_s12 }
  0x16   : > { %s839_s20 = smov (!%p140_p11, %s462_s20), 15  ;;  %p533_p13 = pnand %p532_p12, %p664_p4 }
  0x17   : > { %s471_s21 = sshll.u32 %s839_s20, 8  ;;  %p539_p2 = scmp.lt.s32.totalorder %s537_s13, %s531_s5 }
  0x18   : > { %s683_s24 = scalar_lea.vmem %s827_s0, %s471_s21  ;;  %p534_p0 = pneg %p533_p13 }
  0x19   : > { %v168_v0 = vld [vmem:[%s683_s24 + $0x80] sm:$0xff]  ;;  %v169_v2 = vld [vmem:[%s683_s24 + $0x88] sm:$0xff]  ;;  %v170_v4 = vld [vmem:[%s683_s24 + $0x90] sm:$0xff]  ;;  %p540_p3 = por %p539_p2, %p538_p1 }
  0x1a   : > { %v152_v1 = vld [vmem:[%s683_s24] sm:$0xff]  ;;  %248 = vxpose.xlu1.b32.start [1/16] (narrow) %v168_v0, 32  ;;  %v153_v3 = vld [vmem:[%s683_s24 + $0x8] sm:$0xff]  ;;  %v154_v5 = vld [vmem:[%s683_s24 + $0x10] sm:$0xff] }
  0x1b   : > { %216 = vxpose.xlu0.b32.start [1/16] (narrow) %v152_v1, 32  ;;  %v171_v6 = vld [vmem:[%s683_s24 + $0x98] sm:$0xff]  ;;  %v172_v8 = vld [vmem:[%s683_s24 + $0xa0] sm:$0xff]  ;;  %v173_v10 = vld [vmem:[%s683_s24 + $0xa8] sm:$0xff]  ;;  %p541_p5 = pnand %p540_p3, %p534_p0 }
  0x1c   : > { %v155_v7 = vld [vmem:[%s683_s24 + $0x18] sm:$0xff]  ;;  %v156_v9 = vld [vmem:[%s683_s24 + $0x20] sm:$0xff]  ;;  %v157_v11 = vld [vmem:[%s683_s24 + $0x28] sm:$0xff] }
  0x1d   : > { %v174_v12 = vld [vmem:[%s683_s24 + $0xb0] sm:$0xff]  ;;  %v175_v14 = vld [vmem:[%s683_s24 + $0xb8] sm:$0xff]  ;;  %v176_v16 = vld [vmem:[%s683_s24 + $0xc0] sm:$0xff] }
  0x1e   : > { %249 = vxpose.xlu1.b32.cont [2/16] (narrow) %v169_v2, 32  ;;  %v158_v13 = vld [vmem:[%s683_s24 + $0x30] sm:$0xff]  ;;  %v159_v15 = vld [vmem:[%s683_s24 + $0x38] sm:$0xff]  ;;  %v160_v17 = vld [vmem:[%s683_s24 + $0x40] sm:$0xff] }
  0x1f   : > { %217 = vxpose.xlu0.b32.cont [2/16] (narrow) %v153_v3, 32  ;;  %v177_v18 = vld [vmem:[%s683_s24 + $0xc8] sm:$0xff]  ;;  %v178_v20 = vld [vmem:[%s683_s24 + $0xd0] sm:$0xff]  ;;  %v179_v22 = vld [vmem:[%s683_s24 + $0xd8] sm:$0xff] }
  0x20   : > { %v161_v19 = vld [vmem:[%s683_s24 + $0x48] sm:$0xff]  ;;  %v162_v21 = vld [vmem:[%s683_s24 + $0x50] sm:$0xff]  ;;  %v163_v23 = vld [vmem:[%s683_s24 + $0x58] sm:$0xff] }
  0x21   : > { %v180_v24 = vld [vmem:[%s683_s24 + $0xe0] sm:$0xff]  ;;  %v181_v26 = vld [vmem:[%s683_s24 + $0xe8] sm:$0xff]  ;;  %v182_v28 = vld [vmem:[%s683_s24 + $0xf0] sm:$0xff] }
  0x22   : > { %250 = vxpose.xlu1.b32.cont [3/16] (narrow) %v170_v4, 32  ;;  %v164_v25 = vld [vmem:[%s683_s24 + $0x60] sm:$0xff]  ;;  %v165_v27 = vld [vmem:[%s683_s24 + $0x68] sm:$0xff]  ;;  %v166_v29 = vld [vmem:[%s683_s24 + $0x70] sm:$0xff] }
  0x23   : > { %218 = vxpose.xlu0.b32.cont [3/16] (narrow) %v154_v5, 32  ;;  %v183_v30 = vld [vmem:[%s683_s24 + $0xf8] sm:$0xff]  ;;  %v200_v32 = vld [vmem:[%s683_s24 + $0x180] sm:$0xff]  ;;  %v201_v34 = vld [vmem:[%s683_s24 + $0x188] sm:$0xff] }
  0x24   : > { %v167_v31 = vld [vmem:[%s683_s24 + $0x78] sm:$0xff]  ;;  %v184_v33 = vld [vmem:[%s683_s24 + $0x100] sm:$0xff]  ;;  %v185_v35 = vld [vmem:[%s683_s24 + $0x108] sm:$0xff] }
  0x25   : > { %v202_v36 = vld [vmem:[%s683_s24 + $0x190] sm:$0xff]  ;;  %v203_v38 = vld [vmem:[%s683_s24 + $0x198] sm:$0xff]  ;;  %v204_v40 = vld [vmem:[%s683_s24 + $0x1a0] sm:$0xff] }
  0x26   : > { %251 = vxpose.xlu1.b32.cont [4/16] (narrow) %v171_v6, 32  ;;  %v186_v37 = vld [vmem:[%s683_s24 + $0x110] sm:$0xff]  ;;  %v187_v39 = vld [vmem:[%s683_s24 + $0x118] sm:$0xff]  ;;  %v188_v41 = vld [vmem:[%s683_s24 + $0x120] sm:$0xff] }
  0x27   : > { %219 = vxpose.xlu0.b32.cont [4/16] (narrow) %v155_v7, 32  ;;  %v205_v42 = vld [vmem:[%s683_s24 + $0x1a8] sm:$0xff]  ;;  %v206_v44 = vld [vmem:[%s683_s24 + $0x1b0] sm:$0xff]  ;;  %v207_v46 = vld [vmem:[%s683_s24 + $0x1b8] sm:$0xff] }
  0x28   : > { %v189_v43 = vld [vmem:[%s683_s24 + $0x128] sm:$0xff]  ;;  %v190_v45 = vld [vmem:[%s683_s24 + $0x130] sm:$0xff]  ;;  %v191_v47 = vld [vmem:[%s683_s24 + $0x138] sm:$0xff] }
  0x29   : > { %v208_v48 = vld [vmem:[%s683_s24 + $0x1c0] sm:$0xff]  ;;  %v209_v50 = vld [vmem:[%s683_s24 + $0x1c8] sm:$0xff]  ;;  %v210_v52 = vld [vmem:[%s683_s24 + $0x1d0] sm:$0xff] }
  0x2a   : > { %252 = vxpose.xlu1.b32.cont [5/16] (narrow) %v172_v8, 32  ;;  %v192_v49 = vld [vmem:[%s683_s24 + $0x140] sm:$0xff]  ;;  %v193_v51 = vld [vmem:[%s683_s24 + $0x148] sm:$0xff]  ;;  %v194_v53 = vld [vmem:[%s683_s24 + $0x150] sm:$0xff] }
  0x2b   : > { %220 = vxpose.xlu0.b32.cont [5/16] (narrow) %v156_v9, 32  ;;  %v211_v54 = vld [vmem:[%s683_s24 + $0x1d8] sm:$0xff]  ;;  %v212_v56 = vld [vmem:[%s683_s24 + $0x1e0] sm:$0xff]  ;;  %v213_v58 = vld [vmem:[%s683_s24 + $0x1e8] sm:$0xff] }
  0x2c   : > { %v195_v55 = vld [vmem:[%s683_s24 + $0x158] sm:$0xff]  ;;  %v196_v57 = vld [vmem:[%s683_s24 + $0x160] sm:$0xff]  ;;  %v197_v59 = vld [vmem:[%s683_s24 + $0x168] sm:$0xff] }
  0x2d   : > { %v214_v60 = vld [vmem:[%s683_s24 + $0x1f0] sm:$0xff]  ;;  %v215_v62 = vld [vmem:[%s683_s24 + $0x1f8] sm:$0xff] }
  0x2e   : > { %253 = vxpose.xlu1.b32.cont [6/16] (narrow) %v173_v10, 32  ;;  %v198_v61 = vld [vmem:[%s683_s24 + $0x170] sm:$0xff]  ;;  %v199_v63 = vld [vmem:[%s683_s24 + $0x178] sm:$0xff] }
  0x2f   : > { %221 = vxpose.xlu0.b32.cont [6/16] (narrow) %v157_v11, 32 }
  0x32   : > { %254 = vxpose.xlu1.b32.cont [7/16] (narrow) %v174_v12, 32 }
  0x33   : > { %222 = vxpose.xlu0.b32.cont [7/16] (narrow) %v158_v13, 32 }
  0x36   : > { %255 = vxpose.xlu1.b32.cont [8/16] (narrow) %v175_v14, 32 }
  0x37   : > { %223 = vxpose.xlu0.b32.cont [8/16] (narrow) %v159_v15, 32 }
  0x3a   : > { %256 = vxpose.xlu1.b32.cont [9/16] (narrow) %v176_v16, 32 }
  0x3b   : > { %224 = vxpose.xlu0.b32.cont [9/16] (narrow) %v160_v17, 32 }
  0x3e   : > { %257 = vxpose.xlu1.b32.cont [10/16] (narrow) %v177_v18, 32 }
  0x3f   : > { %225 = vxpose.xlu0.b32.cont [10/16] (narrow) %v161_v19, 32 }
  0x42   : > { %258 = vxpose.xlu1.b32.cont [11/16] (narrow) %v178_v20, 32 }
  0x43   : > { %226 = vxpose.xlu0.b32.cont [11/16] (narrow) %v162_v21, 32 }
  0x46   : > { %259 = vxpose.xlu1.b32.cont [12/16] (narrow) %v179_v22, 32 }
  0x47   : > { %227 = vxpose.xlu0.b32.cont [12/16] (narrow) %v163_v23, 32 }
  0x4a   : > { %260 = vxpose.xlu1.b32.cont [13/16] (narrow) %v180_v24, 32 }
  0x4b   : > { %228 = vxpose.xlu0.b32.cont [13/16] (narrow) %v164_v25, 32 }
  0x4e   : > { %261 = vxpose.xlu1.b32.cont [14/16] (narrow) %v181_v26, 32 }
  0x4f   : > { %229 = vxpose.xlu0.b32.cont [14/16] (narrow) %v165_v27, 32 }
  0x52   : > { %262 = vxpose.xlu1.b32.cont [15/16] (narrow) %v182_v28, 32 }
  0x53   : > { %230 = vxpose.xlu0.b32.cont [15/16] (narrow) %v166_v29, 32 }
  0x56   : > { %263 = vxpose.xlu1.b32.end [16/16] (narrow) %v183_v30, 32 }
  0x57   : > { %231 = vxpose.xlu0.b32.end [16/16] (narrow) %v167_v31, 32 }
  0x5a   : > { %312 = vxpose.xlu1.b32.start [1/16] (narrow) %v200_v32, 32 }
  0x5b   : > { %280 = vxpose.xlu0.b32.start [1/16] (narrow) %v184_v33, 32 }
  0x5e   : > { %313 = vxpose.xlu1.b32.cont [2/16] (narrow) %v201_v34, 32 }
  0x5f   : > { %281 = vxpose.xlu0.b32.cont [2/16] (narrow) %v185_v35, 32 }
  0x62   : > { %314 = vxpose.xlu1.b32.cont [3/16] (narrow) %v202_v36, 32 }
  0x63   : > { %282 = vxpose.xlu0.b32.cont [3/16] (narrow) %v186_v37, 32 }
  0x66   : > { %315 = vxpose.xlu1.b32.cont [4/16] (narrow) %v203_v38, 32 }
  0x67   : > { %283 = vxpose.xlu0.b32.cont [4/16] (narrow) %v187_v39, 32 }
  0x6a   : > { %316 = vxpose.xlu1.b32.cont [5/16] (narrow) %v204_v40, 32 }
  0x6b   : > { %284 = vxpose.xlu0.b32.cont [5/16] (narrow) %v188_v41, 32 }
  0x6e   : > { %317 = vxpose.xlu1.b32.cont [6/16] (narrow) %v205_v42, 32 }
  0x6f   : > { %285 = vxpose.xlu0.b32.cont [6/16] (narrow) %v189_v43, 32 }
  0x72   : > { %318 = vxpose.xlu1.b32.cont [7/16] (narrow) %v206_v44, 32 }
  0x73   : > { %286 = vxpose.xlu0.b32.cont [7/16] (narrow) %v190_v45, 32 }
  0x76   : > { %319 = vxpose.xlu1.b32.cont [8/16] (narrow) %v207_v46, 32 }
  0x77   : > { %287 = vxpose.xlu0.b32.cont [8/16] (narrow) %v191_v47, 32 }
  0x7a   : > { %320 = vxpose.xlu1.b32.cont [9/16] (narrow) %v208_v48, 32 }
  0x7b   : > { %288 = vxpose.xlu0.b32.cont [9/16] (narrow) %v192_v49, 32 }
  0x7e   : > { %321 = vxpose.xlu1.b32.cont [10/16] (narrow) %v209_v50, 32 }
  0x7f   : > { %289 = vxpose.xlu0.b32.cont [10/16] (narrow) %v193_v51, 32 }
  0x82   : > { %322 = vxpose.xlu1.b32.cont [11/16] (narrow) %v210_v52, 32 }
  0x83   : > { %290 = vxpose.xlu0.b32.cont [11/16] (narrow) %v194_v53, 32 }
  0x86   : > { %323 = vxpose.xlu1.b32.cont [12/16] (narrow) %v211_v54, 32 }
  0x87   : > { %291 = vxpose.xlu0.b32.cont [12/16] (narrow) %v195_v55, 32 }
  0x8a   : > { %324 = vxpose.xlu1.b32.cont [13/16] (narrow) %v212_v56, 32 }
  0x8b   : > { %292 = vxpose.xlu0.b32.cont [13/16] (narrow) %v196_v57, 32 }
  0x8e   : > { %325 = vxpose.xlu1.b32.cont [14/16] (narrow) %v213_v58, 32 }
  0x8f   : > { %293 = vxpose.xlu0.b32.cont [14/16] (narrow) %v197_v59, 32 }
  0x92   : > { %326 = vxpose.xlu1.b32.cont [15/16] (narrow) %v214_v60, 32 }
  0x93   : > { %294 = vxpose.xlu0.b32.cont [15/16] (narrow) %v198_v61, 32 }
  0x96   : > { %327 = vxpose.xlu1.b32.end [16/16] (narrow) %v215_v62, 32 }
  0x97   : > { %295 = vxpose.xlu0.b32.end [16/16] (narrow) %v199_v63, 32 }
  0x9a   : > { %v264_v0 = vpop.trf.xlu1 }
  0x9b   : > { %v232_v1 = vpop.trf.xlu0  ;;  %345 = vst [vmem:[%s752_s27 + $0x8] sm:$0xff] %v264_v0 }
  0x9c   : > { %344 = vst [vmem:[%s752_s27] sm:$0xff] %v232_v1 }
  0x9e   : > { %v265_v2 = vpop.trf.xlu1 }
  0x9f   : > { %v233_v3 = vpop.trf.xlu0  ;;  %347 = vst [vmem:[%s752_s27 + $0x18] sm:$0xff] %v265_v2 }
  0xa0   : > { %346 = vst [vmem:[%s752_s27 + $0x10] sm:$0xff] %v233_v3 }
  0xa2   : > { %v266_v4 = vpop.trf.xlu1 }
  0xa3   : > { %v234_v5 = vpop.trf.xlu0  ;;  %349 = vst [vmem:[%s752_s27 + $0x28] sm:$0xff] %v266_v4 }
  0xa4   : > { %348 = vst [vmem:[%s752_s27 + $0x20] sm:$0xff] %v234_v5 }
  0xa6   : > { %v267_v6 = vpop.trf.xlu1 }
  0xa7   : > { %v235_v7 = vpop.trf.xlu0  ;;  %351 = vst [vmem:[%s752_s27 + $0x38] sm:$0xff] %v267_v6 }
  0xa8   : > { %350 = vst [vmem:[%s752_s27 + $0x30] sm:$0xff] %v235_v7 }
  0xda   : > { %v328_v8 = vpop.trf.xlu1 }
  0xdb   : > { %v296_v9 = vpop.trf.xlu0  ;;  %353 = vst [vmem:[%s752_s27 + $0x48] sm:$0xff] %v328_v8 }
  0xdc   : > { %352 = vst [vmem:[%s752_s27 + $0x40] sm:$0xff] %v296_v9 }
  0xde   : > { %v329_v10 = vpop.trf.xlu1 }
  0xdf   : > { %v297_v11 = vpop.trf.xlu0  ;;  %355 = vst [vmem:[%s752_s27 + $0x58] sm:$0xff] %v329_v10 }
  0xe0   : > { %354 = vst [vmem:[%s752_s27 + $0x50] sm:$0xff] %v297_v11 }
  0xe2   : > { %v330_v12 = vpop.trf.xlu1 }
  0xe3   : > { %v298_v13 = vpop.trf.xlu0  ;;  %357 = vst [vmem:[%s752_s27 + $0x68] sm:$0xff] %v330_v12 }
  0xe4   : > { %356 = vst [vmem:[%s752_s27 + $0x60] sm:$0xff] %v298_v13 }
  0xe6   : > { %v331_v14 = vpop.trf.xlu1 }
  0xe7   : > { %v299_v15 = vpop.trf.xlu0  ;;  %359 = vst [vmem:[%s752_s27 + $0x78] sm:$0xff] %v331_v14 }
  0xe8   : > { %358 = vst [vmem:[%s752_s27 + $0x70] sm:$0xff] %v299_v15 }
  0xe9   : > { %544 = shalt.err (!%p541_p5)
}
  0xea   : > { %s545_s15 = scalar_lea.hbm %s773_s3, 2048  ;;  %s549_s21 = scalar_lea.hbm %s828_s1, 16384 }
  0xeb   : > { %p546_p6 = scmp.ne.s32.totalorder %s773_s3, %s545_s15  ;;  %p550_p10 = scmp.lt.u32.totalorder %s773_s3, %s828_s1 }
  0xec   : > { %p551_p11 = scmp.lt.u32.totalorder %s549_s21, %s545_s15  ;;  %p553_p13 = scmp.lt.u32.totalorder %s545_s15, %s773_s3 }
  0xed   : > { %p547_p7 = pnand %p546_p6, %p664_p4 }
  0xee   : > { %p552_p12 = por %p551_p11, %p550_p10 }
  0xef   : > { %p548_p9 = pneg %p547_p7 }
  0xf0   : > { %p554_p0 = por %p553_p13, %p552_p12 }
  0xf2   : > { %p555_p1 = pnand %p554_p0, %p548_p9 }
  0xf4   : > { %558 = shalt.err (!%p555_p1)
}
  0xf5   : > { %s612_s24 = smov 256   ;;  %s613_s25 = smov 16  }
  0xf6   : > { %474 = dma.vmem_to_hbm [thread:$0]  (%p664_p4), %s775_s29, 2048, %s773_s3, %s781_s4, %s612_s24, %s612_s24, %s613_s25  }
  0xf7 PF: > { %p480_p2 = scmp.ge.s32.totalorder %s609_s11, 2  ;;  %s392_s26 = sand.u32 1, %s589_s6  }
  0xf8   : > { %s393_s27 = scalar_lea.sflag [#allocation3], %s392_s26 }
  0xf9   : > { %p477_p3 = pnand %p480_p2, %p671_p8 }
  0xfb   : > { %584 = dma.done.wait (!%p477_p3), %s393_s27, 2048  }
  0xfc   : > { %586 = vsyncadd (!%p477_p3), %s393_s27, 4294965248  ;;  %s14_s11 = sadd.s32 1, %s609_s11   ;;  %s831_s6 = smov %s593_s7 }
  0xfd   : > { %p11_p5 = scmp.ge.s32.totalorder %s14_s11, 10   ;;  %s832_s7 = smov %s597_s8 }
  0xfe   : > { %s833_s8 = smov %s677_s19  ;;  %s834_s9 = smov %s605_s10 }
  0xff   : > { %s835_s10 = smov %s837_s14  ;;  %13 = sbr.rel (!%p11_p5) target bundleno = 4 (0x4), region = 59 }
 0x106   :  { %398 = vsyncpa [#allocation3], 1 }
 0x107   :  { %400 = vsyncpa [#allocation3 + $0x1], 1 }

</bundles_post_ra>
